<compile_context>
chip_gen: v5e
topology: v5e:2x2
jax: 0.10.0
libtpu: 0.0.40
codegen_flags: <defaults>
</compile_context>

<pallas_src>
import functools
import math

import jax
import jax.numpy as jnp
from jax.experimental import pallas as pl
from jax.experimental.pallas import tpu as pltpu

LANE = 128


def make_positional_encoding(d_model, max_len=5000, dtype=jnp.float32):
    """Sinusoidal table identical to the PyTorch module's __init__ (even d_model)."""
    assert d_model % 2 == 0, "sinusoidal table requires even d_model"
    position = jnp.arange(0, max_len, dtype=jnp.float32)[:, None]              # (max_len, 1)
    div_term = jnp.exp(
        jnp.arange(0, d_model, 2, dtype=jnp.float32) * (-math.log(10000.0) / d_model)
    )                                                                           # (d_model//2,)
    ang = position * div_term                                                   # (max_len, d_model//2)
    enc = jnp.zeros((max_len, d_model), dtype=jnp.float32)
    enc = enc.at[:, 0::2].set(jnp.sin(ang))
    enc = enc.at[:, 1::2].set(jnp.cos(ang))
    return enc.astype(dtype)                                                    # (max_len, d_model)


def _pe_add_2d_kernel(x_ref, enc_ref, o_ref, *, num_batch, d_model):
    # x_ref / o_ref: (TS, B*D); enc_ref: (TS, D). D is a multiple of 128, so each
    # per-batch slice is lane-tile aligned -> dense loads, unmasked stores.
    e = enc_ref[...]
    for b in range(num_batch):                       # static unroll (B is small)
        sl = slice(b * d_model, (b + 1) * d_model)
        o_ref[:, sl] = x_ref[:, sl] + e


def _pe_add_3d_kernel(x_ref, enc_ref, o_ref):
    # Fallback (d_model not a multiple of 128): broadcast enc over the batch axis.
    o_ref[...] = x_ref[...] + enc_ref[...][:, None, :]


def _sublane_quantum(dtype):
    # 8 rows for f32, 16 for bf16, 32 for int8/fp8 (packed sublanes).
    return max(8, 32 // jnp.dtype(dtype).itemsize)


def _round_up(x, q):
    return -(-x // q) * q


def _choose_seq_tile(S, B, D, itemsize, quantum,
                     target_x_tile_bytes=8 << 20, resident_cap_bytes=48 << 20):
    """Pick a sequence tile: ~8 MiB of x per step, quantum-aligned, resident-capped."""
    row_bytes = B * D * itemsize
    ts = max(quantum, (target_x_tile_bytes // max(1, row_bytes)) // quantum * quantum)
    s_pad = _round_up(S, quantum)
    ts = min(ts, s_pad)
    # v7x megacore: prefer >= 2 tiles along the "parallel" S axis when possible.
    if ts >= s_pad and S >= 2 * quantum:
        ts = max(quantum, _round_up(pl.cdiv(S, 2), quantum))

    def resident(t):
        # double-buffered x in + out + encoding tile
        return 2 * (2 * t * B * D + t * D) * itemsize

    while ts > quantum and resident(ts) > resident_cap_bytes:
        ts = max(quantum, (ts // 2) // quantum * quantum)
    return int(ts), int(resident(ts))


def positional_encoding_forward(x, encoding):
    """x: (S, B, D); encoding: (max_len, D) pre-cast to x.dtype. Returns x + encoding[:S]."""
    S, B, D = x.shape
    max_len, D_enc = encoding.shape
    assert D == D_enc, f"d_model mismatch: x has {D}, encoding has {D_enc}"
    assert S <= max_len, f"sequence length {S} exceeds max_len {max_len}"
    if encoding.dtype != x.dtype:
        # Prefer building the table in the model dtype at init; this is a fallback.
        encoding = encoding.astype(x.dtype)

    itemsize = jnp.dtype(x.dtype).itemsize
    quantum = _sublane_quantum(x.dtype)
    ts, resident_bytes = _choose_seq_tile(S, B, D, itemsize, quantum)
    num_tiles = pl.cdiv(S, ts)

    vmem_limit = int(min(max(int(resident_bytes * 1.25), 4 << 20), 48 << 20))
    cost = pl.CostEstimate(
        flops=S * B * D,
        transcendentals=0,
        bytes_accessed=(2 * S * B * D + S * D) * itemsize,
    )
    cparams = pltpu.CompilerParams(
        dimension_semantics=("parallel",),     # shards S over the 2 TCs on v7x
        vmem_limit_bytes=vmem_limit,
    )

    if D % LANE == 0:
        # Lane-dense 2D path: collapse (B, D) trailing dims (free, contiguous).
        x2d = x.reshape(S, B * D)
        out2d = pl.pallas_call(
            functools.partial(_pe_add_2d_kernel, num_batch=B, d_model=D),
            out_shape=jax.ShapeDtypeStruct((S, B * D), x.dtype),
            grid=(num_tiles,),
            in_specs=[
                pl.BlockSpec((ts, B * D), lambda i: (i, 0)),   # x tile along S
                pl.BlockSpec((ts, D), lambda i: (i, 0)),       # matching encoding rows
            ],
            out_specs=pl.BlockSpec((ts, B * D), lambda i: (i, 0)),
            compiler_params=cparams,
            cost_estimate=cost,
        )(x2d, encoding)
        return out2d.reshape(S, B, D)

    # Fallback for d_model not a multiple of 128 (non-lane-dense, less efficient).
    return pl.pallas_call(
        _pe_add_3d_kernel,
        out_shape=jax.ShapeDtypeStruct((S, B, D), x.dtype),
        grid=(num_tiles,),
        in_specs=[
            pl.BlockSpec((ts, B, D), lambda i: (i, 0, 0)),
            pl.BlockSpec((ts, D), lambda i: (i, 0)),
        ],
        out_specs=pl.BlockSpec((ts, B, D), lambda i: (i, 0, 0)),
        compiler_params=cparams,
        cost_estimate=cost,
    )(x, encoding)


if __name__ == "__main__":
    # Small shapes consistent with the module's forward: (seq, batch, d_model).
    # d_model = 256 matches the spec and keeps the lane axis a multiple of 128.
    seq_len, batch, d_model = 8, 2, 256
    max_len = 64  # small synthetic max_len (module default is 5000)

    key = jax.random.PRNGKey(0)
    x = jax.random.normal(key, (seq_len, batch, d_model), dtype=jnp.float32)

    encoding = make_positional_encoding(d_model, max_len=max_len, dtype=x.dtype)

    out = jax.block_until_ready(positional_encoding_forward(x, encoding))

    # Reference check (pure JAX) against the PyTorch semantics:
    # x + encoding[:S].unsqueeze(1), broadcast over batch.
    ref = x + encoding[:seq_len][:, None, :]
    assert out.shape == x.shape and out.dtype == x.dtype
    assert jnp.allclose(out, ref, atol=1e-6, rtol=1e-6)

    print("KERNEL_OK")
</pallas_src>

<mosaic_0001>
module attributes {stable_mosaic.version = 11 : i64} {
  func.func @_pe_add_2d_kernel(%arg0: i32, %arg1: memref<8x512xf32, #tpu.memory_space<vmem>>, %arg2: memref<8x256xf32, #tpu.memory_space<vmem>>, %arg3: memref<8x512xf32, #tpu.memory_space<vmem>>) attributes {dimension_semantics = [#tpu.dimension_semantics<parallel>], iteration_bounds = array<i64: 1>, scalar_prefetch = 0 : i64, scratch_operands = 0 : i64, tpu.core_type = #tpu.core_type<tc>, window_params = [{transform_indices = @transform_0, window_bounds = array<i64: 8, 512>}, {transform_indices = @transform_1, window_bounds = array<i64: 8, 256>}, {transform_indices = @transform_2, window_bounds = array<i64: 8, 512>}]} {
    %c0 = arith.constant 0 : index
    %c0_0 = arith.constant 0 : index
    %0 = vector.load %arg2[%c0, %c0_0] : memref<8x256xf32, #tpu.memory_space<vmem>>, vector<8x256xf32>
    %c0_1 = arith.constant 0 : index
    %c0_2 = arith.constant 0 : index
    %1 = vector.load %arg1[%c0_1, %c0_2] : memref<8x512xf32, #tpu.memory_space<vmem>>, vector<8x256xf32>
    %2 = arith.addf %1, %0 : vector<8x256xf32>
    %c0_3 = arith.constant 0 : index
    %c0_4 = arith.constant 0 : index
    %3 = vector.load %arg3[%c0_3, %c0_4] : memref<8x512xf32, #tpu.memory_space<vmem>>, vector<8x256xf32>
    tpu.vector_store %arg3[%c0_3, %c0_4], %2 {strides = array<i32>} : memref<8x512xf32, #tpu.memory_space<vmem>>, vector<8x256xf32>,
    %c0_5 = arith.constant 0 : index
    %c256 = arith.constant 256 : index
    %4 = vector.load %arg1[%c0_5, %c256] : memref<8x512xf32, #tpu.memory_space<vmem>>, vector<8x256xf32>
    %5 = arith.addf %4, %0 : vector<8x256xf32>
    %c0_6 = arith.constant 0 : index
    %c256_7 = arith.constant 256 : index
    %6 = vector.load %arg3[%c0_6, %c256_7] : memref<8x512xf32, #tpu.memory_space<vmem>>, vector<8x256xf32>
    tpu.vector_store %arg3[%c0_6, %c256_7], %5 {strides = array<i32>} : memref<8x512xf32, #tpu.memory_space<vmem>>, vector<8x256xf32>,
    return
  }
  func.func @transform_0(%arg0: i32) -> (i32, i32) {
    %c0_i32 = arith.constant 0 : i32
    %c0_i32_0 = arith.constant 0 : i32
    return %arg0, %c0_i32 : i32, i32
  }
  func.func @transform_1(%arg0: i32) -> (i32, i32) {
    %c0_i32 = arith.constant 0 : i32
    %c0_i32_0 = arith.constant 0 : i32
    return %arg0, %c0_i32 : i32, i32
  }
  func.func @transform_2(%arg0: i32) -> (i32, i32) {
    %c0_i32 = arith.constant 0 : i32
    %c0_i32_0 = arith.constant 0 : i32
    return %arg0, %c0_i32 : i32, i32
  }
}

</mosaic_0001>

<bundles_post_ra>
// kernel: tpu_custom_call.1
= control target key start
LH: loop header
LB: loop body
LE: loop exit
PB: predicated region body
PF: predicated region fallthrough
CT: control target
= control target key end

     0   :  { %7 = vsyncpa [#allocation3], 0  ;;  %s180_s0 = inlined_call_operand.hbm [shape: f32[8,512], index: 0, kind: input, shape index: {}]   ;;  %s181_s1 = inlined_call_operand.hbm [shape: f32[64,256], index: 1, kind: input, shape index: {}]   ;;  %s182_s2 = inlined_call_operand.hbm [shape: f32[8,512], index: 2, kind: output, shape index: {}]  }
   0x1   :  { %8 = vsyncpa [#allocation6], 0 }
   0x2   :  { %9 = vsyncpa [#allocation4], 0  ;;  %s15_s11 = sshll.u32 %s180_s0, 4  ;;  %s153_s12 = smov [#allocation2]   ;;  %s16_s11 = int_to_ptr.hbm [resolvable:$true] %s15_s11 }
   0x3   :  { %s17_s13 = sshll.u32 %s153_s12, 4  ;;  %s26_s16 = sshll.u32 %s181_s1, 4  ;;  %s18_s13 = int_to_ptr.vmem [resolvable:$true] %s17_s13  ;;  %s27_s16 = int_to_ptr.hbm [resolvable:$true] %s26_s16 }
   0x4   :  { %20 = dma.hbm_to_vmem [thread:$0]  %s16_s11, 512, %s18_s13, [#allocation3]  }
   0x5   :  { %s154_s17 = smov [#allocation5]  }
   0x6   :  { %s28_s18 = sshll.u32 %s154_s17, 4  ;;  %s29_s18 = int_to_ptr.vmem [resolvable:$true] %s28_s18 }
   0x7   :  { %31 = dma.hbm_to_vmem [thread:$0]  %s27_s16, 256, %s29_s18, [#allocation6]  }
   0x8   :  { %147 = dma.done.wait [#allocation3], 512  }
   0x9   :  { %148 = vsyncadd [#allocation3], 4294966784 }
   0xa   :  { %149 = dma.done.wait [#allocation6], 256  }
   0xb   :  { %150 = vsyncadd [#allocation6], 4294967040  ;;  %v40_v0 = vld [vmem:[#allocation5] sm:$0xff]  ;;  %v41_v2 = vld [vmem:[#allocation5 + $0x8] sm:$0xff]  ;;  %s155_s0 = smov [#allocation7]   ;;  %s61_s21 = sshll.u32 %s182_s2, 4  ;;  %s62_s21 = int_to_ptr.hbm [resolvable:$true] %s61_s21 }
   0xc   :  { %v42_v1 = vld [vmem:[#allocation2] sm:$0xff]  ;;  %v43_v4 = vld [vmem:[#allocation2 + $0x8] sm:$0xff]  ;;  %v48_v5 = vld [vmem:[#allocation2 + $0x10] sm:$0xff]  ;;  %s59_s19 = sshll.u32 %s155_s0, 4  ;;  %s60_s19 = int_to_ptr.vmem [resolvable:$true] %s59_s19 }
   0xd   :  { %v44_v3 = vadd.f32 %v42_v1, %v40_v0  ;;  %v49_v6 = vld [vmem:[#allocation2 + $0x18] sm:$0xff]  ;;  %v45_v7 = vadd.f32 %v43_v4, %v41_v2  ;;  %v50_v8 = vadd.f32 %v48_v5, %v40_v0 }
   0xe   :  { %v51_v9 = vadd.f32 %v49_v6, %v41_v2 }
   0xf   :  { %46 = vst [vmem:[#allocation7] sm:$0xff] %v44_v3 }
  0x10   :  { %47 = vst [vmem:[#allocation7 + $0x8] sm:$0xff] %v45_v7 }
  0x11   :  { %52 = vst [vmem:[#allocation7 + $0x10] sm:$0xff] %v50_v8 }
  0x12   :  { %53 = vst [vmem:[#allocation7 + $0x18] sm:$0xff] %v51_v9 }
  0x13   :  { %64 = dma.vmem_to_hbm [thread:$0]  %s60_s19, 512, %s62_s21, [#allocation4]  }
  0x14   :  { %151 = dma.done.wait [#allocation4], 512  }
  0x15   :  { %152 = vsyncadd [#allocation4], 4294966784 }
  0x16   :  { %69 = vsyncpa [#allocation3], 1 }
  0x17   :  { %70 = vsyncpa [#allocation6], 1 }
  0x18   :  { %71 = vsyncpa [#allocation4], 1 }

</bundles_post_ra>
